<compile_context>
chip_gen: v7x
topology: tpu7x:2x2x1
jax: 0.10.0
libtpu: 0.0.40
codegen_flags: <defaults>
</compile_context>

<pallas_src>
import functools
import math

import jax
import jax.numpy as jnp
from jax.experimental import pallas as pl
from jax.experimental.pallas import tpu as pltpu

_MIB = 1024 * 1024
_TARGET_BLOCK_BYTES = 4 * _MIB          # per-array block budget
_LANE_W = 1024                          # lane-dense slab width (8 * 128)


def _cdiv(a, b):
    return -(-a // b)


def _round_up(x, m):
    return _cdiv(x, m) * m


@functools.lru_cache(maxsize=1)
def _is_v7x():
    # Only v7x has 2 TensorCores per chip; gate the "split single block in two"
    # heuristic on it (on v5e/v6e it is a purely serial extra pipeline step).
    # TODO(synk): if "parallel" semantics don't shard across the 2 v7x TCs,
    # switch to an explicit core split via pl.core_map / CORE_PARALLEL.
    try:
        kind = jax.devices()[0].device_kind.lower()
        return ("v7" in kind) or ("7x" in kind)
    except Exception:
        return False


def _vmem_limit_bytes(needed_bytes):
    cap = 48 * _MIB if _is_v7x() else 64 * _MIB
    return int(min(cap, max(32 * _MIB, needed_bytes + 2 * _MIB)))


def _elementwise_loss(x, t, type_loss):
    # x, t are float32 here.
    if type_loss == 'L1':
        return jnp.abs(x - t)
    elif type_loss == 'CE':
        return -(t * jnp.log(jnp.maximum(x, 1e-20)))
    else:  # 'L2' default
        return (x - t) ** 2


# --------------------------------------------------------------------------
# Kernels
# --------------------------------------------------------------------------
def _noreduce_kernel(x_ref, t_ref, o_ref, *, type_loss):
    x = x_ref[...].astype(jnp.float32)
    t = t_ref[...].astype(jnp.float32)
    o_ref[...] = _elementwise_loss(x, t, type_loss).astype(o_ref.dtype)


def _reduce_kernel(x_ref, t_ref, o_ref, *, type_loss, scale, l):
    # (tile_r, L) block; reduce over L on the idle MXU (ones-dot), then relayout
    # only the narrow (tile_r, 1) column to a lane-dense (1, tile_r) row.
    x = x_ref[...].astype(jnp.float32)
    t = t_ref[...].astype(jnp.float32)
    ret = _elementwise_loss(x, t, type_loss)
    ones = jnp.ones((l, 1), jnp.float32)
    col = jnp.dot(ret, ones, preferred_element_type=jnp.float32)   # (tile_r, 1)
    if scale != 1.0:
        col = col * scale
    o_ref[...] = jnp.transpose(col).astype(o_ref.dtype)            # (1, tile_r)


def _packed_reduce_kernel(x_ref, t_ref, ones_ref, o_ref, *, type_loss, scale):
    # Lane-packed block (tile_rp, 128): each row holds g = 128 // L groups.
    # Per-group reduction via block-diagonal ones matmul on the MXU.
    x = x_ref[...].astype(jnp.float32)
    t = t_ref[...].astype(jnp.float32)
    ret = _elementwise_loss(x, t, type_loss)
    red = jnp.dot(ret, ones_ref[...], preferred_element_type=jnp.float32)
    if scale != 1.0:
        red = red * scale
    o_ref[...] = red.astype(o_ref.dtype)                           # (tile_rp, g)


def _chunked_reduce_kernel(x_ref, t_ref, o_ref, acc_ref, *, type_loss, scale,
                           l, l_chunk):
    # Grid axis 1 walks L in chunks; VMEM accumulator, init/finalize via pl.when.
    k = pl.program_id(1)

    @pl.when(k == 0)
    def _():
        acc_ref[...] = jnp.zeros_like(acc_ref)

    x = x_ref[...].astype(jnp.float32)
    t = t_ref[...].astype(jnp.float32)
    ret = _elementwise_loss(x, t, type_loss)
    if l % l_chunk != 0:
        # Mask out-of-range columns of the partial last chunk (where, not mul,
        # so garbage NaNs in the padded region cannot leak into the sum).
        col = jax.lax.broadcasted_iota(jnp.int32, (1, l_chunk), 1)
        ret = jnp.where(col + k * l_chunk < l, ret, 0.0)
    ones = jnp.ones((l_chunk, 1), jnp.float32)
    acc_ref[...] += jnp.dot(ret, ones, preferred_element_type=jnp.float32)

    @pl.when(k == pl.num_programs(1) - 1)
    def _():
        col_acc = acc_ref[...]
        if scale != 1.0:
            col_acc = col_acc * scale
        o_ref[...] = jnp.transpose(col_acc).astype(o_ref.dtype)


# --------------------------------------------------------------------------
# Wrappers
# --------------------------------------------------------------------------
def _seglosses_elementwise(inputs, targets, type_loss):
    orig_shape = inputs.shape
    n = int(math.prod(orig_shape)) if orig_shape else 1
    itemsize = jnp.dtype(inputs.dtype).itemsize

    rows = _cdiv(n, _LANE_W)
    tile_r = max(8, (_TARGET_BLOCK_BYTES // (_LANE_W * itemsize)) // 8 * 8)
    if rows <= tile_r:
        tile_r = rows                       # single full-array block
    num_tiles = _cdiv(rows, tile_r)
    if num_tiles < 2 and _is_v7x() and rows >= 16:
        # Give both v7x TensorCores work for single-block problems.
        tile_r = max(8, _round_up(_cdiv(rows, 2), 8))
        num_tiles = _cdiv(rows, tile_r)

    n_slab = rows * _LANE_W
    x_flat = inputs.reshape(-1)
    t_flat = targets.reshape(-1)
    if n_slab != n:
        # Only pad when the flat size is not already a multiple of the slab
        # width (pad + trim are extra HBM passes, so they are gated off).
        x_flat = jnp.pad(x_flat, (0, n_slab - n))
        t_flat = jnp.pad(t_flat, (0, n_slab - n))
    x2 = x_flat.reshape(rows, _LANE_W)
    t2 = t_flat.reshape(rows, _LANE_W)

    block_bytes = tile_r * _LANE_W * itemsize
    kernel = functools.partial(_noreduce_kernel, type_loss=type_loss)
    out = pl.pallas_call(
        kernel,
        out_shape=jax.ShapeDtypeStruct((rows, _LANE_W), inputs.dtype),
        grid=(num_tiles,),
        in_specs=[pl.BlockSpec((tile_r, _LANE_W), lambda i: (i, 0)),
                  pl.BlockSpec((tile_r, _LANE_W), lambda i: (i, 0))],
        out_specs=pl.BlockSpec((tile_r, _LANE_W), lambda i: (i, 0)),
        compiler_params=pltpu.CompilerParams(
            dimension_semantics=("parallel",),
            vmem_limit_bytes=_vmem_limit_bytes(6 * block_bytes)),
    )(x2, t2)
    out = out.reshape(-1)
    if n_slab != n:
        out = out[:n]
    return out.reshape(orig_shape)


def _reduce_small_l(inputs, targets, type_loss, scale, R, L, itemsize):
    # Lane-pack: (R, L) -> (R/g, g*L = 128), reduce per group in-kernel.
    g = 128 // L
    R_pad = _round_up(R, g)
    x2 = inputs.reshape(R, L)
    t2 = targets.reshape(R, L)
    if R_pad != R:
        x2 = jnp.pad(x2, ((0, R_pad - R), (0, 0)))
        t2 = jnp.pad(t2, ((0, R_pad - R), (0, 0)))
    Rp = R_pad // g
    x3 = x2.reshape(Rp, 128)
    t3 = t2.reshape(Rp, 128)

    tile_rp = max(8, (_TARGET_BLOCK_BYTES // (128 * itemsize)) // 8 * 8)
    if Rp <= tile_rp:
        tile_rp = Rp
    num_tiles = _cdiv(Rp, tile_rp)
    if num_tiles < 2 and _is_v7x() and Rp >= 16:
        tile_rp = max(8, _round_up(_cdiv(Rp, 2), 8))
        num_tiles = _cdiv(Rp, tile_rp)

    # Block-diagonal ones: ones[i, j] = 1 iff i // L == j   -> (128, g)
    row = jax.lax.broadcasted_iota(jnp.int32, (128, g), 0)
    col = jax.lax.broadcasted_iota(jnp.int32, (128, g), 1)
    ones_mat = (row // L == col).astype(jnp.float32)

    in_block = tile_rp * 128 * itemsize
    out_block = tile_rp * 128 * itemsize          # (tile_rp, g) lane-padded
    needed = 2 * (2 * in_block + out_block) + 128 * 128 * 4

    kernel = functools.partial(_packed_reduce_kernel, type_loss=type_loss,
                               scale=scale)
    out = pl.pallas_call(
        kernel,
        out_shape=jax.ShapeDtypeStruct((Rp, g), inputs.dtype),
        grid=(num_tiles,),
        in_specs=[pl.BlockSpec((tile_rp, 128), lambda i: (i, 0)),
                  pl.BlockSpec((tile_rp, 128), lambda i: (i, 0)),
                  pl.BlockSpec((128, g), lambda i: (0, 0))],
        out_specs=pl.BlockSpec((tile_rp, g), lambda i: (i, 0)),
        compiler_params=pltpu.CompilerParams(
            dimension_semantics=("parallel",),
            vmem_limit_bytes=_vmem_limit_bytes(needed)),
    )(x3, t3, ones_mat)
    out = out.reshape(-1)
    if R_pad != R:
        out = out[:R]
    return out


def _reduce_full_l(inputs, targets, type_loss, scale, R, L, L_pad, itemsize):
    x2 = inputs.reshape(R, L)
    t2 = targets.reshape(R, L)

    # Budget uses the lane-PADDED row width (real VMEM footprint).
    tile_r = max(128, (_TARGET_BLOCK_BYTES // (L_pad * itemsize)) // 128 * 128)
    if R <= tile_r:
        tile_r = R
    num_tiles = _cdiv(R, tile_r)
    if num_tiles < 2 and _is_v7x() and R >= 256:
        tile_r = max(128, _round_up(_cdiv(R, 2), 128))
        num_tiles = _cdiv(R, tile_r)

    in_block = tile_r * L_pad * itemsize
    out_block = 8 * _round_up(tile_r, 128) * itemsize
    needed = 2 * (2 * in_block + out_block)

    kernel = functools.partial(_reduce_kernel, type_loss=type_loss,
                               scale=scale, l=L)
    out = pl.pallas_call(
        kernel,
        out_shape=jax.ShapeDtypeStruct((1, R), inputs.dtype),
        grid=(num_tiles,),
        in_specs=[pl.BlockSpec((tile_r, L), lambda i: (i, 0)),
                  pl.BlockSpec((tile_r, L), lambda i: (i, 0))],
        out_specs=pl.BlockSpec((1, tile_r), lambda i: (0, i)),
        compiler_params=pltpu.CompilerParams(
            dimension_semantics=("parallel",),
            vmem_limit_bytes=_vmem_limit_bytes(needed)),
    )(x2, t2)
    return out.reshape(R)


def _reduce_chunked_l(inputs, targets, type_loss, scale, R, L, itemsize,
                      force_l_chunk=None):
    x2 = inputs.reshape(R, L)
    t2 = targets.reshape(R, L)

    tile_r = 128 if R >= 128 else R
    if force_l_chunk is not None:
        l_chunk = force_l_chunk
    else:
        l_chunk = max(128, (_TARGET_BLOCK_BYTES // (tile_r * itemsize)) // 128 * 128)
    num_row_tiles = _cdiv(R, tile_r)
    num_l_chunks = _cdiv(L, l_chunk)

    in_block = tile_r * l_chunk * itemsize
    out_block = 8 * _round_up(tile_r, 128) * itemsize
    needed = 2 * (2 * in_block + out_block) + tile_r * 128 * 4

    kernel = functools.partial(_chunked_reduce_kernel, type_loss=type_loss,
                               scale=scale, l=L, l_chunk=l_chunk)
    out = pl.pallas_call(
        kernel,
        out_shape=jax.ShapeDtypeStruct((1, R), inputs.dtype),
        grid=(num_row_tiles, num_l_chunks),
        in_specs=[pl.BlockSpec((tile_r, l_chunk), lambda i, k: (i, k)),
                  pl.BlockSpec((tile_r, l_chunk), lambda i, k: (i, k))],
        out_specs=pl.BlockSpec((1, tile_r), lambda i, k: (0, i)),
        scratch_shapes=[pltpu.VMEM((tile_r, 1), jnp.float32)],
        compiler_params=pltpu.CompilerParams(
            dimension_semantics=("parallel", "arbitrary"),
            vmem_limit_bytes=_vmem_limit_bytes(needed)),
    )(x2, t2)
    return out.reshape(R)


def _seglosses_reduce(inputs, targets, type_loss, reduction, _force_l_chunk=None):
    orig_shape = inputs.shape
    L = int(orig_shape[-1])
    R = int(math.prod(orig_shape[:-1])) if len(orig_shape) > 1 else 1
    itemsize = jnp.dtype(inputs.dtype).itemsize
    scale = (1.0 / L) if reduction == 'mean' else 1.0

    if _force_l_chunk is None and L < 128 and 128 % L == 0:
        out_flat = _reduce_small_l(inputs, targets, type_loss, scale, R, L,
                                   itemsize)
    else:
        L_pad = _round_up(L, 128)
        need_chunk = (_force_l_chunk is not None or
                      128 * L_pad * itemsize > _TARGET_BLOCK_BYTES)
        if need_chunk:
            out_flat = _reduce_chunked_l(inputs, targets, type_loss, scale, R, L,
                                         itemsize, _force_l_chunk)
        else:
            out_flat = _reduce_full_l(inputs, targets, type_loss, scale, R, L,
                                      L_pad, itemsize)
    return out_flat.reshape(orig_shape[:-1])


def seglosses_pallas(inputs, targets, type_loss='L2', reduction=None):
    """Pallas TPU implementation of the `seglosses` forward pass."""
    assert inputs.shape == targets.shape
    if reduction is None:
        return _seglosses_elementwise(inputs, targets, type_loss)
    return _seglosses_reduce(inputs, targets, type_loss, reduction)


def _reference(inputs, targets, type_loss='L2', reduction=None):
    x = inputs.astype(jnp.float32)
    t = targets.astype(jnp.float32)
    ret = _elementwise_loss(x, t, type_loss)
    if reduction is not None:
        ret = jnp.mean(ret, -1) if reduction == 'mean' else jnp.sum(ret, -1)
    return ret.astype(inputs.dtype)


if __name__ == "__main__":
    key = jax.random.PRNGKey(0)
    k1, k2, k3, k4, k5, k6 = jax.random.split(key, 6)

    failures = []

    def check(name, out, ref):
        out = jax.block_until_ready(out)
        if out.shape != ref.shape:
            failures.append((name, "shape", out.shape, ref.shape))
        elif not jnp.allclose(out, ref, atol=1e-5, rtol=1e-5):
            err = float(jnp.max(jnp.abs(out.astype(jnp.float32) -
                                        ref.astype(jnp.float32))))
            failures.append((name, "value", err))

    # NCHW-style segmentation maps: batch=2, channels=4, spatial=16x16.
    x = jax.random.uniform(k1, (2, 4, 16, 16), jnp.float32, 1e-3, 1.0)
    t = jax.random.uniform(k2, (2, 4, 16, 16), jnp.float32, 0.0, 1.0)
    for type_loss in ('L2', 'L1', 'CE'):
        for reduction in (None, 'mean', 'sum'):
            out = seglosses_pallas(x, t, type_loss=type_loss, reduction=reduction)
            check(f"{type_loss}/{reduction}", out,
                  _reference(x, t, type_loss, reduction))

    # Ragged elementwise (exercises the gated pad path).
    xr = jax.random.uniform(k3, (3, 5, 7), jnp.float32, 1e-3, 1.0)
    tr = jax.random.uniform(k4, (3, 5, 7), jnp.float32, 0.0, 1.0)
    check("ragged/none", seglosses_pallas(xr, tr, 'L2', None),
          _reference(xr, tr, 'L2', None))

    # General reduce path (L=160 is not a divisor of 128).
    xg = jax.random.uniform(k5, (2, 4, 16, 160), jnp.float32, 1e-3, 1.0)
    tg = jax.random.uniform(k6, (2, 4, 16, 160), jnp.float32, 0.0, 1.0)
    check("general/mean", seglosses_pallas(xg, tg, 'L1', 'mean'),
          _reference(xg, tg, 'L1', 'mean'))
    check("general/sum", seglosses_pallas(xg, tg, 'CE', 'sum'),
          _reference(xg, tg, 'CE', 'sum'))

    # Chunked-L accumulator path, forced small chunk to exercise it (+ masking
    # of the partial last chunk) at test size.
    out = _seglosses_reduce(xg, tg, 'L2', 'mean', _force_l_chunk=128)
    check("chunked/mean", out, _reference(xg, tg, 'L2', 'mean'))

    if failures:
        for f in failures:
            print("FAIL", f)
    else:
        print("KERNEL_OK")
</pallas_src>

<mosaic_0001>
module attributes {stable_mosaic.version = 11 : i64} {
  func.func @_noreduce_kernel(%arg0: i32, %arg1: memref<2x1024xf32, #tpu.memory_space<vmem>>, %arg2: memref<2x1024xf32, #tpu.memory_space<vmem>>, %arg3: memref<2x1024xf32, #tpu.memory_space<vmem>>) attributes {dimension_semantics = [#tpu.dimension_semantics<parallel>], iteration_bounds = array<i64: 1>, scalar_prefetch = 0 : i64, scratch_operands = 0 : i64, tpu.core_type = #tpu.core_type<tc>, window_params = [{transform_indices = @transform_0, window_bounds = array<i64: 2, 1024>}, {transform_indices = @transform_1, window_bounds = array<i64: 2, 1024>}, {transform_indices = @transform_2, window_bounds = array<i64: 2, 1024>}]} {
    %c0 = arith.constant 0 : index
    %c0_0 = arith.constant 0 : index
    %0 = vector.load %arg1[%c0, %c0_0] : memref<2x1024xf32, #tpu.memory_space<vmem>>, vector<2x1024xf32>
    %c0_1 = arith.constant 0 : index
    %c0_2 = arith.constant 0 : index
    %1 = vector.load %arg2[%c0_1, %c0_2] : memref<2x1024xf32, #tpu.memory_space<vmem>>, vector<2x1024xf32>
    %2 = arith.subf %0, %1 : vector<2x1024xf32>
    %3 = arith.mulf %2, %2 : vector<2x1024xf32>
    %c0_3 = arith.constant 0 : index
    %c0_4 = arith.constant 0 : index
    %4 = vector.load %arg3[%c0_3, %c0_4] : memref<2x1024xf32, #tpu.memory_space<vmem>>, vector<2x1024xf32>
    tpu.vector_store %arg3[%c0_3, %c0_4], %3 {strides = array<i32>} : memref<2x1024xf32, #tpu.memory_space<vmem>>, vector<2x1024xf32>,
    return
  }
  func.func @transform_0(%arg0: i32) -> (i32, i32) {
    %c0_i32 = arith.constant 0 : i32
    %c0_i32_0 = arith.constant 0 : i32
    return %arg0, %c0_i32 : i32, i32
  }
  func.func @transform_1(%arg0: i32) -> (i32, i32) {
    %c0_i32 = arith.constant 0 : i32
    %c0_i32_0 = arith.constant 0 : i32
    return %arg0, %c0_i32 : i32, i32
  }
  func.func @transform_2(%arg0: i32) -> (i32, i32) {
    %c0_i32 = arith.constant 0 : i32
    %c0_i32_0 = arith.constant 0 : i32
    return %arg0, %c0_i32 : i32, i32
  }
}

</mosaic_0001>

<bundles_post_ra>
// kernel: tpu_custom_call.1
= control target key start
LH: loop header
LB: loop body
LE: loop exit
PB: predicated region body
PF: predicated region fallthrough
CT: control target
= control target key end

     0   :  { %7 = vsyncpa [#allocation3], 0  ;;  %s191_s0 = inlined_call_operand.hbm [shape: f32[2,1024], index: 0, kind: input, shape index: {}]   ;;  %s192_s1 = inlined_call_operand.hbm [shape: f32[2,1024], index: 1, kind: input, shape index: {}]   ;;  %s193_s2 = inlined_call_operand.hbm [shape: f32[2,1024], index: 2, kind: output, shape index: {}]  }
   0x1   :  { %8 = vsyncpa [#allocation6], 0 }
   0x2   :  { %9 = vsyncpa [#allocation4], 0  ;;  %s137_s9 = smov [#allocation2]   ;;  %s138_s11 = smov [#allocation5]  }
   0x3   :  { %s16_s10 = sshll.u32 %s137_s9, 4  ;;  %s26_s12 = sshll.u32 %s138_s11, 4  ;;  %s17_s10 = int_to_ptr.vmem [resolvable:$true] %s16_s10  ;;  %s27_s12 = int_to_ptr.vmem [resolvable:$true] %s26_s12 }
   0x4   :  { %s65_s15 = scalar_lea.hbm %s191_s0, 256 }
   0x5   :  { %p66_p0 = scmp.ne.s32.totalorder %s191_s0, %s65_s15  ;;  %p69_p1 = scmp.lt.u32.totalorder %s65_s15, %s191_s0 }
   0x7   :  { %p71_p2 = pnand %p69_p1, %p66_p0 }
   0x9   :  { %74 = shalt.err (!%p71_p2)
}
   0xa   :  { %s75_s20 = scalar_lea.vmem %s17_s10, 256  ;;  %p80_p4 = scmp.lt.s32.totalorder %s17_s10, %s17_s10 }
   0xb   :  { %p76_p3 = scmp.ne.s32.totalorder %s17_s10, %s75_s20  ;;  %p81_p5 = scmp.lt.s32.totalorder %s75_s20, %s75_s20 }
   0xd   :  { %p82_p6 = por %p81_p5, %p80_p4 }
   0xf   :  { %p83_p7 = pnand %p82_p6, %p76_p3 }
  0x11   :  { %86 = shalt.err (!%p83_p7)
}
  0x12   :  { %19 = dma.hbm_to_vmem [thread:$0]  %s191_s0, 256, %s17_s10, [#allocation3]  }
  0x13   :  { %s87_s25 = scalar_lea.hbm %s192_s1, 256 }
  0x14   :  { %p88_p8 = scmp.ne.s32.totalorder %s192_s1, %s87_s25  ;;  %p91_p9 = scmp.lt.u32.totalorder %s87_s25, %s192_s1 }
  0x16   :  { %p93_p10 = pnand %p91_p9, %p88_p8 }
  0x18   :  { %96 = shalt.err (!%p93_p10)
}
  0x19   :  { %s97_s30 = scalar_lea.vmem %s27_s12, 256  ;;  %p102_p12 = scmp.lt.s32.totalorder %s27_s12, %s27_s12 }
  0x1a   :  { %p98_p11 = scmp.ne.s32.totalorder %s27_s12, %s97_s30  ;;  %p103_p13 = scmp.lt.s32.totalorder %s97_s30, %s97_s30 }
  0x1c   :  { %p104_p0 = por %p103_p13, %p102_p12 }
  0x1e   :  { %p105_p1 = pnand %p104_p0, %p98_p11 }
  0x20   :  { %108 = shalt.err (!%p105_p1)
}
  0x21   :  { %29 = dma.hbm_to_vmem [thread:$0]  %s192_s1, 256, %s27_s12, [#allocation6]  }
  0x22   :  { %131 = dma.done.wait [#allocation3], 256  }
  0x23   :  { %132 = vsyncadd [#allocation3], 4294967040 }
  0x24   :  { %133 = dma.done.wait [#allocation6], 256  }
  0x25   :  { %134 = vsyncadd [#allocation6], 4294967040  ;;  %v36_v0 = vld [vmem:[#allocation2] sm:$0xff]  ;;  %v38_v1 = vld [vmem:[#allocation5] sm:$0xff]  ;;  %s139_s4 = smov [#allocation7]  }
  0x26   :  { %v37_v2 = vld [vmem:[#allocation2 + $0x8] sm:$0xff]  ;;  %v40_v3 = vsub.f32 %v36_v0, %v38_v1  ;;  %v39_v4 = vld [vmem:[#allocation5 + $0x8] sm:$0xff]  ;;  %s52_s5 = sshll.u32 %s139_s4, 4  ;;  %s53_s5 = int_to_ptr.vmem [resolvable:$true] %s52_s5 }
  0x27   :  { %v41_v5 = vsub.f32 %v37_v2, %v39_v4  ;;  %s109_s6 = scalar_lea.vmem %s53_s5, 256  ;;  %p114_p3 = scmp.lt.s32.totalorder %s53_s5, %s53_s5 }
  0x28   :  { %v42_v6 = vmul.f32 %v40_v3, %v40_v3  ;;  %p110_p2 = scmp.ne.s32.totalorder %s53_s5, %s109_s6  ;;  %p115_p4 = scmp.lt.s32.totalorder %s109_s6, %s109_s6 }
  0x29   :  { %v43_v7 = vmul.f32 %v41_v5, %v41_v5 }
  0x2a   :  { %44 = vst [vmem:[#allocation7] sm:$0xff] %v42_v6  ;;  %p116_p5 = por %p115_p4, %p114_p3 }
  0x2b   :  { %45 = vst [vmem:[#allocation7 + $0x8] sm:$0xff] %v43_v7 }
  0x2c   :  { %p117_p6 = pnand %p116_p5, %p110_p2 }
  0x2e   :  { %120 = shalt.err (!%p117_p6)
}
  0x2f   :  { %s121_s8 = scalar_lea.hbm %s193_s2, 256 }
  0x30   :  { %p122_p7 = scmp.ne.s32.totalorder %s193_s2, %s121_s8  ;;  %p125_p8 = scmp.lt.u32.totalorder %s121_s8, %s193_s2 }
  0x32   :  { %p127_p9 = pnand %p125_p8, %p122_p7 }
  0x34   :  { %130 = shalt.err (!%p127_p9)
}
  0x35   :  { %55 = dma.vmem_to_hbm [thread:$0]  %s53_s5, 256, %s193_s2, [#allocation4]  }
  0x36   :  { %135 = dma.done.wait [#allocation4], 256  }
  0x37   :  { %136 = vsyncadd [#allocation4], 4294967040 }
  0x38   :  { %59 = vsyncpa [#allocation3], 1 }
  0x39   :  { %60 = vsyncpa [#allocation6], 1 }
  0x3a   :  { %61 = vsyncpa [#allocation4], 1 }

</bundles_post_ra>
